<compile_context>
chip_gen: v5e
topology: v5e:2x2
jax: 0.10.0
libtpu: 0.0.40
codegen_flags: <defaults>
</compile_context>

<pallas_src>
import jax
import jax.numpy as jnp
from jax.experimental import pallas as pl
from jax.experimental.pallas import tpu as pltpu


def _round_up(a, m):
    return ((a + m - 1) // m) * m


def _pad2d(a, rows, cols):
    return jnp.pad(a, ((0, rows - a.shape[0]), (0, cols - a.shape[1])))


def node_model_kernel(x_ref, col_ref, ea_ref, bat_ref, u_ref,
                      w1x_ref, w1m_ref, w1u_ref, b1_ref,
                      w2_ref, b2_ref, w3_ref, b3_ref,
                      out_ref, msg_acc):
    i = pl.program_id(0)                     # node-tile index (parallel)
    e = pl.program_id(1)                     # edge-tile index (reduction, last axis)
    n_tile = msg_acc.shape[0]
    e_tile = col_ref.shape[1]

    @pl.when(e == 0)
    def _init():
        msg_acc[...] = jnp.zeros_like(msg_acc)

    # scatter_add(edge_attr, col) restricted to this node tile, as a one-hot MXU
    # matmul.  Offsetting the [1, E_T] col vector (instead of the [N_T, E_T] iota)
    # keeps per-step VALU work on the large operand to one compare + one select.
    col_local = col_ref[...] - i * n_tile                                  # [1, E_T]
    rows = jax.lax.broadcasted_iota(jnp.int32, (n_tile, e_tile), 0)        # local ids
    oh = (rows == col_local).astype(jnp.float32)                           # [N_T, E_T]
    msg_acc[...] += jnp.dot(oh, ea_ref[...],
                            preferred_element_type=jnp.float32)            # [N_T, De]

    @pl.when(e == pl.num_programs(1) - 1)
    def _finalize():
        # u[batch] gather for this node tile (hoisted out of the edge loop).
        bat = bat_ref[...]                                                  # [1, N_T]
        nb = u_ref.shape[0]
        gids = jax.lax.broadcasted_iota(jnp.int32, (nb, n_tile), 0)         # [B, N_T]
        oh_b = (gids == bat).astype(jnp.float32)                            # [B, N_T]
        u_n = jax.lax.dot_general(oh_b, u_ref[...],
                                  (((0,), (0,)), ((), ())),
                                  preferred_element_type=jnp.float32)       # [N_T, Dg]

        # MLP_GN: cat([x, msg, u_n]) @ W1 folded into split weights (equivalent).
        h = (jnp.dot(x_ref[...], w1x_ref[...], preferred_element_type=jnp.float32)
             + jnp.dot(msg_acc[...], w1m_ref[...], preferred_element_type=jnp.float32)
             + jnp.dot(u_n, w1u_ref[...], preferred_element_type=jnp.float32)
             + b1_ref[...])
        h = jnp.maximum(h, 0.0)
        # dropout (p given at construction; eval / p=0 -> identity)
        h = jnp.dot(h, w2_ref[...], preferred_element_type=jnp.float32) + b2_ref[...]
        h = jnp.maximum(h, 0.0)
        out_ref[...] = (jnp.dot(h, w3_ref[...], preferred_element_type=jnp.float32)
                        + b3_ref[...]).astype(out_ref.dtype)


def node_model_forward(x, edge_index, edge_attr, u, batch, params,
                       *, n_tile=256, e_tile=2048):
    """x:[N,Dn] f32, edge_index:[2,E] i32, edge_attr:[E,De] f32,
    u:[B,Dg] f32, batch:[N] i32."""
    assert n_tile % 128 == 0 and e_tile % 128 == 0  # lane-dense index-vector blocks
    N, Dn = x.shape
    E, De = edge_attr.shape
    B, Dg = u.shape
    w1, b1, w2, b2, w3, b3 = (params[k] for k in ("w1", "b1", "w2", "b2", "w3", "b3"))
    H = w1.shape[1]
    Dout = w3.shape[1]
    Din = Dn + De + Dg

    # ---- lane-dense padded widths (MXU / unmasked-store efficiency) ----
    Hp = _round_up(H, 128)
    Dop = _round_up(Dout, 128)

    # ---- tile & pad the node / edge axes ----
    # Default tiles keep the in-kernel one-hot (N_T * E_T * 4B = 2 MiB) comfortably
    # inside the scoped-VMEM budget on v5e/v6e/v7x while amortizing per-step overhead.
    if N >= n_tile:
        N_T, N_pad = n_tile, _round_up(N, n_tile)
    else:
        N_T = N_pad = _round_up(N, 8)
    if E >= e_tile:
        E_T, E_pad = e_tile, _round_up(E, e_tile)
    else:
        E_T = E_pad = _round_up(E, 8)

    x_p = _pad2d(x.astype(jnp.float32), N_pad, Dn)
    ea_p = _pad2d(edge_attr.astype(jnp.float32), E_pad, De)
    # lane-major index vectors; padded edges get col = -1 (never matches a node id)
    col = edge_index[1].astype(jnp.int32)
    col_p = jnp.pad(col, (0, E_pad - E), constant_values=-1).reshape(1, E_pad)
    bat_p = jnp.pad(batch.astype(jnp.int32), (0, N_pad - N)).reshape(1, N_pad)

    # split + zero-pad the first-layer weight to emulate the concat exactly
    w1x = _pad2d(w1[:Dn], Dn, Hp)
    w1m = _pad2d(w1[Dn:Dn + De], De, Hp)
    w1u = _pad2d(w1[Dn + De:], Dg, Hp)
    b1p = _pad2d(b1.reshape(1, -1), 1, Hp)
    w2p = _pad2d(w2, Hp, Hp)
    b2p = _pad2d(b2.reshape(1, -1), 1, Hp)
    w3p = _pad2d(w3, Hp, Dop)
    b3p = _pad2d(b3.reshape(1, -1), 1, Dop)

    grid = (N_pad // N_T, E_pad // E_T)
    const = lambda i, e: (0, 0)

    in_specs = [
        pl.BlockSpec((N_T, Dn), lambda i, e: (i, 0)),   # x   (per node tile, resident over e)
        pl.BlockSpec((1, E_T), lambda i, e: (0, e)),    # col (streamed over edge tiles)
        pl.BlockSpec((E_T, De), lambda i, e: (e, 0)),   # edge_attr (streamed)
        pl.BlockSpec((1, N_T), lambda i, e: (0, i)),    # batch
        pl.BlockSpec((B, Dg), const),                   # u   (resident)
        pl.BlockSpec((Dn, Hp), const),                  # w1x
        pl.BlockSpec((De, Hp), const),                  # w1m
        pl.BlockSpec((Dg, Hp), const),                  # w1u
        pl.BlockSpec((1, Hp), const),                   # b1
        pl.BlockSpec((Hp, Hp), const),                  # w2
        pl.BlockSpec((1, Hp), const),                   # b2
        pl.BlockSpec((Hp, Dop), const),                 # w3
        pl.BlockSpec((1, Dop), const),                  # b3
    ]
    out_spec = pl.BlockSpec((N_T, Dop), lambda i, e: (i, 0))

    flops = (2 * N_pad * E_pad * De                          # one-hot scatter matmul
             + 2 * N_pad * B * Dg                            # u[batch] gather matmul
             + 2 * N_pad * (Din * Hp + Hp * Hp + Hp * Dop))  # MLP
    bytes_accessed = 4 * ((N_pad // N_T) * (ea_p.size + col_p.size)  # edges re-streamed per node tile
                          + x_p.size + bat_p.size + u.size
                          + Din * Hp + Hp * Hp + Hp * Dop + 3 * Hp + Dop
                          + N_pad * Dop)

    out = pl.pallas_call(
        node_model_kernel,
        out_shape=jax.ShapeDtypeStruct((N_pad, Dop), jnp.float32),
        grid_spec=pltpu.PrefetchScalarGridSpec(
            num_scalar_prefetch=0,
            grid=grid,
            in_specs=in_specs,
            out_specs=out_spec,
            scratch_shapes=[pltpu.VMEM((N_T, De), jnp.float32)],
        ),
        compiler_params=pltpu.CompilerParams(
            dimension_semantics=("parallel", "arbitrary"),
        ),
        cost_estimate=pl.CostEstimate(
            flops=int(flops), transcendentals=0, bytes_accessed=int(bytes_accessed)),
    )(x_p, col_p, ea_p, bat_p, u.astype(jnp.float32),
      w1x, w1m, w1u, b1p, w2p, b2p, w3p, b3p)

    return out[:N, :Dout]


def init_params(key, node_in, edge_in, glob_in, hidden, out):
    """Deterministic PyTorch-Linear-style init (uniform +/- 1/sqrt(fan_in))."""
    din = node_in + edge_in + glob_in
    ks = jax.random.split(key, 6)

    def lin(kw, kb, fan_in, fan_out):
        bound = 1.0 / jnp.sqrt(fan_in)
        w = jax.random.uniform(kw, (fan_in, fan_out), jnp.float32, -bound, bound)
        b = jax.random.uniform(kb, (fan_out,), jnp.float32, -bound, bound)
        return w, b

    w1, b1 = lin(ks[0], ks[1], din, hidden)
    w2, b2 = lin(ks[2], ks[3], hidden, hidden)
    w3, b3 = lin(ks[4], ks[5], hidden, out)
    return dict(w1=w1, b1=b1, w2=w2, b2=b2, w3=w3, b3=b3)


def reference_forward(x, edge_index, edge_attr, u, batch, params):
    N = x.shape[0]
    col = edge_index[1]
    msg = jax.ops.segment_sum(edge_attr, col, num_segments=N)
    out = jnp.concatenate([x, msg, u[batch]], axis=-1)
    h = jnp.maximum(out @ params["w1"] + params["b1"], 0.0)
    h = jnp.maximum(h @ params["w2"] + params["b2"], 0.0)
    return h @ params["w3"] + params["b3"]


def _run_case(key, *, N, E, B, node_in, edge_in, glob_in, hidden, node_out,
              n_tile, e_tile):
    k_x, k_ea, k_u, k_ei, k_b, k_p = jax.random.split(key, 6)
    x = jax.random.normal(k_x, (N, node_in), jnp.float32)
    edge_attr = jax.random.normal(k_ea, (E, edge_in), jnp.float32)
    u = jax.random.normal(k_u, (B, glob_in), jnp.float32)
    edge_index = jax.random.randint(k_ei, (2, E), 0, N, jnp.int32)
    batch = jnp.sort(jax.random.randint(k_b, (N,), 0, B, jnp.int32))
    params = init_params(k_p, node_in, edge_in, glob_in, hidden, node_out)

    y = node_model_forward(x, edge_index, edge_attr, u, batch, params,
                           n_tile=n_tile, e_tile=e_tile)
    y = jax.block_until_ready(y)

    y_ref = reference_forward(x, edge_index, edge_attr, u, batch, params)
    assert y.shape == (N, node_out)
    assert jnp.allclose(y, y_ref, atol=1e-4, rtol=1e-4), \
        float(jnp.max(jnp.abs(y - y_ref)))


if __name__ == "__main__":
    key = jax.random.PRNGKey(0)
    k1, k2 = jax.random.split(key)

    # Small, single-tile case at module-scale shapes.
    _run_case(k1, N=8, E=16, B=2, node_in=4, edge_in=4, glob_in=4,
              hidden=32, node_out=8, n_tile=256, e_tile=2048)

    # Multi-tile case: exercises the streamed edge-reduction axis, the node-tile
    # parallel axis, and the ragged padding paths.
    _run_case(k2, N=200, E=600, B=3, node_in=4, edge_in=4, glob_in=4,
              hidden=32, node_out=8, n_tile=128, e_tile=256)

    print("KERNEL_OK")
</pallas_src>

<mosaic_0001>
module attributes {stable_mosaic.version = 11 : i64} {
  func.func @node_model_kernel(%arg0: i32, %arg1: i32, %arg2: memref<8x4xf32, #tpu.memory_space<vmem>>, %arg3: memref<1x16xi32, #tpu.memory_space<vmem>>, %arg4: memref<16x4xf32, #tpu.memory_space<vmem>>, %arg5: memref<1x8xi32, #tpu.memory_space<vmem>>, %arg6: memref<2x4xf32, #tpu.memory_space<vmem>>, %arg7: memref<4x128xf32, #tpu.memory_space<vmem>>, %arg8: memref<4x128xf32, #tpu.memory_space<vmem>>, %arg9: memref<4x128xf32, #tpu.memory_space<vmem>>, %arg10: memref<1x128xf32, #tpu.memory_space<vmem>>, %arg11: memref<128x128xf32, #tpu.memory_space<vmem>>, %arg12: memref<1x128xf32, #tpu.memory_space<vmem>>, %arg13: memref<128x128xf32, #tpu.memory_space<vmem>>, %arg14: memref<1x128xf32, #tpu.memory_space<vmem>>, %arg15: memref<8x128xf32, #tpu.memory_space<vmem>>, %arg16: memref<8x4xf32, #tpu.memory_space<vmem>>) attributes {dimension_semantics = [#tpu.dimension_semantics<parallel>, #tpu.dimension_semantics<arbitrary>], iteration_bounds = array<i64: 1, 1>, scalar_prefetch = 0 : i64, scratch_operands = 1 : i64, tpu.core_type = #tpu.core_type<tc>, window_params = [{transform_indices = @transform_0, window_bounds = array<i64: 8, 4>}, {transform_indices = @transform_1, window_bounds = array<i64: 1, 16>}, {transform_indices = @transform_2, window_bounds = array<i64: 16, 4>}, {transform_indices = @transform_3, window_bounds = array<i64: 1, 8>}, {pipeline_mode = #tpu.pipeline_mode<synchronous>, transform_indices = @transform_4, window_bounds = array<i64: 2, 4>}, {pipeline_mode = #tpu.pipeline_mode<synchronous>, transform_indices = @transform_5, window_bounds = array<i64: 4, 128>}, {pipeline_mode = #tpu.pipeline_mode<synchronous>, transform_indices = @transform_6, window_bounds = array<i64: 4, 128>}, {pipeline_mode = #tpu.pipeline_mode<synchronous>, transform_indices = @transform_7, window_bounds = array<i64: 4, 128>}, {pipeline_mode = #tpu.pipeline_mode<synchronous>, transform_indices = @transform_8, window_bounds = array<i64: 1, 128>}, {pipeline_mode = #tpu.pipeline_mode<synchronous>, transform_indices = @transform_9, window_bounds = array<i64: 128, 128>}, {pipeline_mode = #tpu.pipeline_mode<synchronous>, transform_indices = @transform_10, window_bounds = array<i64: 1, 128>}, {pipeline_mode = #tpu.pipeline_mode<synchronous>, transform_indices = @transform_11, window_bounds = array<i64: 128, 128>}, {pipeline_mode = #tpu.pipeline_mode<synchronous>, transform_indices = @transform_12, window_bounds = array<i64: 1, 128>}, {transform_indices = @transform_13, window_bounds = array<i64: 8, 128>}]} {
    %c0_i32 = arith.constant 0 : i32
    %0 = arith.cmpi eq, %arg1, %c0_i32 : i32
    %1 = arith.extui %0 : i1 to i32
    %c0_i32_0 = arith.constant 0 : i32
    %2 = arith.cmpi ne, %1, %c0_i32_0 : i32
    scf.if %2 {
      %cst_10 = arith.constant 0.000000e+00 : f32
      %20 = vector.broadcast %cst_10 : f32 to vector<8x4xf32>
      %c0_11 = arith.constant 0 : index
      %c0_12 = arith.constant 0 : index
      %21 = vector.load %arg16[%c0_11, %c0_12] : memref<8x4xf32, #tpu.memory_space<vmem>>, vector<8x4xf32>
      tpu.vector_store %arg16[%c0_11, %c0_12], %20 {strides = array<i32>} : memref<8x4xf32, #tpu.memory_space<vmem>>, vector<8x4xf32>,
    } else {
    }
    %c0 = arith.constant 0 : index
    %c0_1 = arith.constant 0 : index
    %3 = vector.load %arg3[%c0, %c0_1] : memref<1x16xi32, #tpu.memory_space<vmem>>, vector<1x16xi32>
    %c8_i32 = arith.constant 8 : i32
    %4 = arith.muli %arg0, %c8_i32 : i32
    %5 = vector.broadcast %4 : i32 to vector<1x16xi32>
    %6 = arith.subi %3, %5 : vector<1x16xi32>
    %7 = tpu.iota {dimensions = array<i32: 0>} : vector<8x16xi32>
    %8 = vector.broadcast %6 : vector<1x16xi32> to vector<8x16xi32>
    %9 = arith.cmpi eq, %7, %8 : vector<8x16xi32>
    %10 = arith.extui %9 : vector<8x16xi1> to vector<8x16xi32>
    %11 = arith.sitofp %10 : vector<8x16xi32> to vector<8x16xf32>
    %c0_2 = arith.constant 0 : index
    %c0_3 = arith.constant 0 : index
    %12 = vector.load %arg16[%c0_2, %c0_3] : memref<8x4xf32, #tpu.memory_space<vmem>>, vector<8x4xf32>
    %c0_4 = arith.constant 0 : index
    %c0_5 = arith.constant 0 : index
    %13 = vector.load %arg4[%c0_4, %c0_5] : memref<16x4xf32, #tpu.memory_space<vmem>>, vector<16x4xf32>
    %cst = arith.constant dense<0.000000e+00> : vector<8x4xf32>
    %14 = tpu.matmul %11, %13, %cst {dimension_numbers = #tpu.dot_dimension_numbers<[1], [0], [0], [1], [0, 0, 1, 1], [], []>} : vector<8x16xf32>, vector<16x4xf32>, vector<8x4xf32> -> vector<8x4xf32>
    %15 = arith.addf %12, %14 : vector<8x4xf32>
    %c0_6 = arith.constant 0 : index
    %c0_7 = arith.constant 0 : index
    %16 = vector.load %arg16[%c0_6, %c0_7] : memref<8x4xf32, #tpu.memory_space<vmem>>, vector<8x4xf32>
    tpu.vector_store %arg16[%c0_6, %c0_7], %15 {strides = array<i32>} : memref<8x4xf32, #tpu.memory_space<vmem>>, vector<8x4xf32>,
    %c0_i32_8 = arith.constant 0 : i32
    %17 = arith.cmpi eq, %arg1, %c0_i32_8 : i32
    %18 = arith.extui %17 : i1 to i32
    %c0_i32_9 = arith.constant 0 : i32
    %19 = arith.cmpi ne, %18, %c0_i32_9 : i32
    scf.if %19 {
      %c0_10 = arith.constant 0 : index
      %c0_11 = arith.constant 0 : index
      %20 = vector.load %arg5[%c0_10, %c0_11] : memref<1x8xi32, #tpu.memory_space<vmem>>, vector<1x8xi32>
      %21 = tpu.iota {dimensions = array<i32: 0>} : vector<2x8xi32>
      %22 = vector.broadcast %20 : vector<1x8xi32> to vector<2x8xi32>
      %23 = arith.cmpi eq, %21, %22 : vector<2x8xi32>
      %24 = arith.extui %23 : vector<2x8xi1> to vector<2x8xi32>
      %25 = arith.sitofp %24 : vector<2x8xi32> to vector<2x8xf32>
      %c0_12 = arith.constant 0 : index
      %c0_13 = arith.constant 0 : index
      %26 = vector.load %arg6[%c0_12, %c0_13] : memref<2x4xf32, #tpu.memory_space<vmem>>, vector<2x4xf32>
      %cst_14 = arith.constant dense<0.000000e+00> : vector<8x4xf32>
      %27 = tpu.matmul %25, %26, %cst_14 {dimension_numbers = #tpu.dot_dimension_numbers<[0], [0], [1], [1], [0, 1, 1, 1], [], []>} : vector<2x8xf32>, vector<2x4xf32>, vector<8x4xf32> -> vector<8x4xf32>
      %c0_15 = arith.constant 0 : index
      %c0_16 = arith.constant 0 : index
      %28 = vector.load %arg2[%c0_15, %c0_16] : memref<8x4xf32, #tpu.memory_space<vmem>>, vector<8x4xf32>
      %c0_17 = arith.constant 0 : index
      %c0_18 = arith.constant 0 : index
      %29 = vector.load %arg7[%c0_17, %c0_18] : memref<4x128xf32, #tpu.memory_space<vmem>>, vector<4x128xf32>
      %cst_19 = arith.constant dense<0.000000e+00> : vector<8x128xf32>
      %30 = tpu.matmul %28, %29, %cst_19 {dimension_numbers = #tpu.dot_dimension_numbers<[1], [0], [0], [1], [0, 0, 1, 1], [], []>} : vector<8x4xf32>, vector<4x128xf32>, vector<8x128xf32> -> vector<8x128xf32>
      %c0_20 = arith.constant 0 : index
      %c0_21 = arith.constant 0 : index
      %31 = vector.load %arg16[%c0_20, %c0_21] : memref<8x4xf32, #tpu.memory_space<vmem>>, vector<8x4xf32>
      %c0_22 = arith.constant 0 : index
      %c0_23 = arith.constant 0 : index
      %32 = vector.load %arg8[%c0_22, %c0_23] : memref<4x128xf32, #tpu.memory_space<vmem>>, vector<4x128xf32>
      %cst_24 = arith.constant dense<0.000000e+00> : vector<8x128xf32>
      %33 = tpu.matmul %31, %32, %cst_24 {dimension_numbers = #tpu.dot_dimension_numbers<[1], [0], [0], [1], [0, 0, 1, 1], [], []>} : vector<8x4xf32>, vector<4x128xf32>, vector<8x128xf32> -> vector<8x128xf32>
      %34 = arith.addf %30, %33 : vector<8x128xf32>
      %c0_25 = arith.constant 0 : index
      %c0_26 = arith.constant 0 : index
      %35 = vector.load %arg9[%c0_25, %c0_26] : memref<4x128xf32, #tpu.memory_space<vmem>>, vector<4x128xf32>
      %cst_27 = arith.constant dense<0.000000e+00> : vector<8x128xf32>
      %36 = tpu.matmul %27, %35, %cst_27 {dimension_numbers = #tpu.dot_dimension_numbers<[1], [0], [0], [1], [0, 0, 1, 1], [], []>} : vector<8x4xf32>, vector<4x128xf32>, vector<8x128xf32> -> vector<8x128xf32>
      %37 = arith.addf %34, %36 : vector<8x128xf32>
      %c0_28 = arith.constant 0 : index
      %c0_29 = arith.constant 0 : index
      %38 = vector.load %arg10[%c0_28, %c0_29] : memref<1x128xf32, #tpu.memory_space<vmem>>, vector<1x128xf32>
      %39 = vector.broadcast %38 : vector<1x128xf32> to vector<8x128xf32>
      %40 = arith.addf %37, %39 : vector<8x128xf32>
      %cst_30 = arith.constant 0.000000e+00 : f32
      %41 = vector.broadcast %cst_30 : f32 to vector<8x128xf32>
      %42 = arith.maximumf %40, %41 : vector<8x128xf32>
      %c0_31 = arith.constant 0 : index
      %c0_32 = arith.constant 0 : index
      %43 = vector.load %arg11[%c0_31, %c0_32] : memref<128x128xf32, #tpu.memory_space<vmem>>, vector<128x128xf32>
      %cst_33 = arith.constant dense<0.000000e+00> : vector<8x128xf32>
      %44 = tpu.matmul %42, %43, %cst_33 {dimension_numbers = #tpu.dot_dimension_numbers<[1], [0], [0], [1], [0, 0, 1, 1], [], []>} : vector<8x128xf32>, vector<128x128xf32>, vector<8x128xf32> -> vector<8x128xf32>
      %c0_34 = arith.constant 0 : index
      %c0_35 = arith.constant 0 : index
      %45 = vector.load %arg12[%c0_34, %c0_35] : memref<1x128xf32, #tpu.memory_space<vmem>>, vector<1x128xf32>
      %46 = vector.broadcast %45 : vector<1x128xf32> to vector<8x128xf32>
      %47 = arith.addf %44, %46 : vector<8x128xf32>
      %cst_36 = arith.constant 0.000000e+00 : f32
      %48 = vector.broadcast %cst_36 : f32 to vector<8x128xf32>
      %49 = arith.maximumf %47, %48 : vector<8x128xf32>
      %c0_37 = arith.constant 0 : index
      %c0_38 = arith.constant 0 : index
      %50 = vector.load %arg13[%c0_37, %c0_38] : memref<128x128xf32, #tpu.memory_space<vmem>>, vector<128x128xf32>
      %cst_39 = arith.constant dense<0.000000e+00> : vector<8x128xf32>
      %51 = tpu.matmul %49, %50, %cst_39 {dimension_numbers = #tpu.dot_dimension_numbers<[1], [0], [0], [1], [0, 0, 1, 1], [], []>} : vector<8x128xf32>, vector<128x128xf32>, vector<8x128xf32> -> vector<8x128xf32>
      %c0_40 = arith.constant 0 : index
      %c0_41 = arith.constant 0 : index
      %52 = vector.load %arg14[%c0_40, %c0_41] : memref<1x128xf32, #tpu.memory_space<vmem>>, vector<1x128xf32>
      %53 = vector.broadcast %52 : vector<1x128xf32> to vector<8x128xf32>
      %54 = arith.addf %51, %53 : vector<8x128xf32>
      %c0_42 = arith.constant 0 : index
      %c0_43 = arith.constant 0 : index
      %55 = vector.load %arg15[%c0_42, %c0_43] : memref<8x128xf32, #tpu.memory_space<vmem>>, vector<8x128xf32>
      tpu.vector_store %arg15[%c0_42, %c0_43], %54 {strides = array<i32>} : memref<8x128xf32, #tpu.memory_space<vmem>>, vector<8x128xf32>,
    } else {
    }
    return
  }
  func.func @transform_0(%arg0: i32, %arg1: i32) -> (i32, i32) {
    %c0_i32 = arith.constant 0 : i32
    %c0_i32_0 = arith.constant 0 : i32
    return %arg0, %c0_i32 : i32, i32
  }
  func.func @transform_1(%arg0: i32, %arg1: i32) -> (i32, i32) {
    %c0_i32 = arith.constant 0 : i32
    %c0_i32_0 = arith.constant 0 : i32
    return %c0_i32, %arg1 : i32, i32
  }
  func.func @transform_2(%arg0: i32, %arg1: i32) -> (i32, i32) {
    %c0_i32 = arith.constant 0 : i32
    %c0_i32_0 = arith.constant 0 : i32
    return %arg1, %c0_i32 : i32, i32
  }
  func.func @transform_3(%arg0: i32, %arg1: i32) -> (i32, i32) {
    %c0_i32 = arith.constant 0 : i32
    %c0_i32_0 = arith.constant 0 : i32
    return %c0_i32, %arg0 : i32, i32
  }
  func.func @transform_4(%arg0: i32, %arg1: i32) -> (i32, i32) {
    %c0_i32 = arith.constant 0 : i32
    %c0_i32_0 = arith.constant 0 : i32
    %c0_i32_1 = arith.constant 0 : i32
    return %c0_i32, %c0_i32_0 : i32, i32
  }
  func.func @transform_5(%arg0: i32, %arg1: i32) -> (i32, i32) {
    %c0_i32 = arith.constant 0 : i32
    %c0_i32_0 = arith.constant 0 : i32
    %c0_i32_1 = arith.constant 0 : i32
    return %c0_i32, %c0_i32_0 : i32, i32
  }
  func.func @transform_6(%arg0: i32, %arg1: i32) -> (i32, i32) {
    %c0_i32 = arith.constant 0 : i32
    %c0_i32_0 = arith.constant 0 : i32
    %c0_i32_1 = arith.constant 0 : i32
    return %c0_i32, %c0_i32_0 : i32, i32
  }
  func.func @transform_7(%arg0: i32, %arg1: i32) -> (i32, i32) {
    %c0_i32 = arith.constant 0 : i32
    %c0_i32_0 = arith.constant 0 : i32
    %c0_i32_1 = arith.constant 0 : i32
    return %c0_i32, %c0_i32_0 : i32, i32
  }
  func.func @transform_8(%arg0: i32, %arg1: i32) -> (i32, i32) {
    %c0_i32 = arith.constant 0 : i32
    %c0_i32_0 = arith.constant 0 : i32
    %c0_i32_1 = arith.constant 0 : i32
    return %c0_i32, %c0_i32_0 : i32, i32
  }
  func.func @transform_9(%arg0: i32, %arg1: i32) -> (i32, i32) {
    %c0_i32 = arith.constant 0 : i32
    %c0_i32_0 = arith.constant 0 : i32
    %c0_i32_1 = arith.constant 0 : i32
    return %c0_i32, %c0_i32_0 : i32, i32
  }
  func.func @transform_10(%arg0: i32, %arg1: i32) -> (i32, i32) {
    %c0_i32 = arith.constant 0 : i32
    %c0_i32_0 = arith.constant 0 : i32
    %c0_i32_1 = arith.constant 0 : i32
    return %c0_i32, %c0_i32_0 : i32, i32
  }
  func.func @transform_11(%arg0: i32, %arg1: i32) -> (i32, i32) {
    %c0_i32 = arith.constant 0 : i32
    %c0_i32_0 = arith.constant 0 : i32
    %c0_i32_1 = arith.constant 0 : i32
    return %c0_i32, %c0_i32_0 : i32, i32
  }
  func.func @transform_12(%arg0: i32, %arg1: i32) -> (i32, i32) {
    %c0_i32 = arith.constant 0 : i32
    %c0_i32_0 = arith.constant 0 : i32
    %c0_i32_1 = arith.constant 0 : i32
    return %c0_i32, %c0_i32_0 : i32, i32
  }
  func.func @transform_13(%arg0: i32, %arg1: i32) -> (i32, i32) {
    %c0_i32 = arith.constant 0 : i32
    %c0_i32_0 = arith.constant 0 : i32
    return %arg0, %c0_i32 : i32, i32
  }
}

</mosaic_0001>

<bundles_post_ra>
// kernel: tpu_custom_call.1
= control target key start
LH: loop header
LB: loop body
LE: loop exit
PB: predicated region body
PF: predicated region fallthrough
CT: control target
= control target key end

     0   :  { %18 = vsyncpa [#allocation4], 0  ;;  %s609_s0 = inlined_call_operand.vmem [shape: f32[8,4], index: 0, kind: input, shape index: {}]   ;;  %s610_s1 = inlined_call_operand.vmem [shape: s32[1,16], index: 1, kind: input, shape index: {}]   ;;  %s611_s2 = inlined_call_operand.vmem [shape: f32[16,4], index: 2, kind: input, shape index: {}]   ;;  %s612_s3 = inlined_call_operand.vmem [shape: s32[1,8], index: 3, kind: input, shape index: {}]   ;;  %s613_s4 = inlined_call_operand.vmem [shape: f32[2,4], index: 4, kind: input, shape index: {}]   ;;  %s614_s5 = inlined_call_operand.vmem [shape: f32[4,128], index: 5, kind: input, shape index: {}]   ;;  %s615_s6 = inlined_call_operand.vmem [shape: f32[4,128], index: 6, kind: input, shape index: {}]   ;;  %s616_s7 = inlined_call_operand.vmem [shape: f32[4,128], index: 7, kind: input, shape index: {}]   ;;  %s617_s8 = inlined_call_operand.vmem [shape: f32[1,128], index: 8, kind: input, shape index: {}]   ;;  %s618_s9 = inlined_call_operand.hbm [shape: f32[128,128], index: 9, kind: input, shape index: {}]   ;;  %s619_s10 = inlined_call_operand.vmem [shape: f32[1,128], index: 10, kind: input, shape index: {}]   ;;  %s620_s11 = inlined_call_operand.hbm [shape: f32[128,128], index: 11, kind: input, shape index: {}]   ;;  %s621_s12 = inlined_call_operand.vmem [shape: f32[1,128], index: 12, kind: input, shape index: {}]   ;;  %s622_s13 = inlined_call_operand.hbm [shape: f32[8,128], index: 13, kind: output, shape index: {}]  }
   0x1   :  { %19 = vsyncpa [#allocation7], 0 }
   0x2   :  { %20 = vsyncpa [#allocation5], 0  ;;  %s43_s27 = sshll.u32 %s618_s9, 4  ;;  %s483_s28 = smov [#allocation3]   ;;  %s44_s27 = int_to_ptr.hbm [resolvable:$true] %s43_s27 }
   0x3   :  { %s45_s29 = sshll.u32 %s483_s28, 4  ;;  %s58_s15 = sshll.u32 %s620_s11, 4  ;;  %s46_s29 = int_to_ptr.vmem [resolvable:$true] %s45_s29  ;;  %s59_s15 = int_to_ptr.hbm [resolvable:$true] %s58_s15 }
   0x4   :  { %s484_s16 = smov 128   ;;  %s485_s17 = smov 8  }
   0x5   :  { %51 = dma.hbm_to_vmem [thread:$0]  %s44_s27, 2048, %s46_s29, [#allocation4], %s484_s16, %s484_s16, %s485_s17  }
   0x6   :  { %s486_s18 = smov [#allocation6]  }
   0x7   :  { %s60_s19 = sshll.u32 %s486_s18, 4  ;;  %s61_s19 = int_to_ptr.vmem [resolvable:$true] %s60_s19 }
   0x8   :  { %66 = dma.hbm_to_vmem [thread:$0]  %s59_s15, 2048, %s61_s19, [#allocation7], %s484_s16, %s484_s16, %s485_s17  }
   0x9   :  { %477 = dma.done.wait [#allocation4], 2048  }
   0xa   :  { %478 = vsyncadd [#allocation4], 4294965248 }
   0xb   :  { %479 = dma.done.wait [#allocation7], 2048  }
   0xc   :  { %480 = vsyncadd [#allocation7], 4294965248  ;;  %vm81_vm0 = vcmask 31744   ;;  %v87_v0 = vlaneseq  ;;  %v487_v1 = vmov 0.0   ;;  %v400_v3 = vld [vmem:[%s612_s3] ss:$0 sm:$0xff] }
   0xd   :  { %82 = vst.msk [vmem:[#allocation2] sm:$0xff] %vm81_vm0, %v487_v1  ;;  %v95_v4 = vld [vmem:[%s611_s2 + $0x8] sm:$0xff]  ;;  %vm168_vm1 = vcmask 1041408   ;;  %v94_v5 = vld [vmem:[%s611_s2] sm:$0xff]  ;;  %vm96_vm2 = vcmask 130048   ;;  %vm199_vm5 = vcmask 1043456  }
   0xe   :  { %v88_v2 = vshrl.u32 %v87_v0, 7  ;;  %114 = vmatpush.msra.mxu0 %v95_v4  ;;  %v401_v6 = vld [vmem:[%s610_s1] ss:$0 sm:$0xff]  ;;  %vm164_vm6 = vcmask 15360   ;;  %v297_v20 = vld [vmem:[#allocation3 + $0x70] sm:$0xff]  ;;  %v296_v21 = vld [vmem:[#allocation3 + $0x68] sm:$0xff] }
   0xf   :  { %v131_v7 = vld [vmem:[%s613_s4] sm:$0x3]  ;;  %v295_v22 = vld [vmem:[#allocation3 + $0x60] sm:$0xff]  ;;  %v293_v24 = vld [vmem:[#allocation3 + $0x50] sm:$0xff]  ;;  %s488_s16 = smov [#allocation8]   ;;  %s372_s9 = sshll.u32 %s622_s13, 4  ;;  %s373_s9 = int_to_ptr.hbm [resolvable:$true] %s372_s9 }
  0x10   :  { %vm128_vm3 = vcmp.eq.s32.totalorder %v88_v2, %v400_v3  ;;  %115 = vmatpush.msra.mxu0 %v94_v5  ;;  %vm90_vm4 = vcmp.eq.s32.totalorder %v88_v2, %v401_v6  ;;  %386 = vmatpush.msk.msra.mxu1 %vm168_vm1, %v131_v7  ;;  %v193_v12 = vld [vmem:[%s614_s5] sm:$0xf]  ;;  %v292_v25 = vld [vmem:[#allocation3 + $0x48] sm:$0xff]  ;;  %v291_v26 = vld [vmem:[#allocation3 + $0x40] sm:$0xff]  ;;  %s370_s17 = sshll.u32 %s488_s16, 4  ;;  %s371_s17 = int_to_ptr.vmem [resolvable:$true] %s370_s17 }
  0x11   :  { %v385_v8 = vsel %vm128_vm3, 1.0, %v487_v1  ;;  %v383_v9 = vsel %vm90_vm4, 1.0, %v487_v1  ;;  %v195_v13 = vld [vmem:[%s615_s6] sm:$0xf]  ;;  %v289_v28 = vld [vmem:[#allocation3 + $0x30] sm:$0xff]  ;;  %v288_v29 = vld [vmem:[#allocation3 + $0x28] sm:$0xff] }
  0x12   :  { %132 = vxpose.xlu0.b32.start.end [1/1] (short) (narrow) %v385_v8, 8  ;;  %384 = vmatmul.msk.f32.vlgmr.msra.gmra.mxu0 %vm96_vm2, %v383_v9  ;;  %v249_v16 = vld [vmem:[%s616_s7] sm:$0xf]  ;;  %v287_v30 = vld [vmem:[#allocation3 + $0x20] sm:$0xff]  ;;  %v285_v33 = vld [vmem:[#allocation3 + $0x10] sm:$0xff] }
  0x13   :  { %390 = vmatpush.msk.msrb.mxu1 %vm199_vm5, %v193_v12  ;;  %388 = vmatpush.msk.msrb.mxu0 %vm199_vm5, %v195_v13  ;;  %v192_v18 = vld [vmem:[%s609_s0] sm:$0xff]  ;;  %v284_v34 = vld [vmem:[#allocation3 + $0x8] sm:$0xff]  ;;  %v283_v35 = vld [vmem:[#allocation3] sm:$0xff] }
  0x14   :  { %v93_v10 = vld [vmem:[#allocation2] sm:$0xff]  ;;  %v338_v37 = vld [vmem:[#allocation6 + $0x70] sm:$0xff]  ;;  %v337_v38 = vld [vmem:[#allocation6 + $0x68] sm:$0xff] }
  0x15   :  { %v298_v19 = vld [vmem:[#allocation3 + $0x78] sm:$0xff]  ;;  %v336_v39 = vld [vmem:[#allocation6 + $0x60] sm:$0xff]  ;;  %v334_v41 = vld [vmem:[#allocation6 + $0x50] sm:$0xff] }
  0x16   :  { %303 = vmatpush.msra.mxu2 %v298_v19  ;;  %v294_v23 = vld [vmem:[#allocation3 + $0x58] sm:$0xff]  ;;  %v333_v42 = vld [vmem:[#allocation6 + $0x48] sm:$0xff]  ;;  %v332_v43 = vld [vmem:[#allocation6 + $0x40] sm:$0xff] }
  0x17   :  { %v290_v27 = vld [vmem:[#allocation3 + $0x38] sm:$0xff]  ;;  %v330_v46 = vld [vmem:[#allocation6 + $0x30] sm:$0xff]  ;;  %v329_v47 = vld [vmem:[#allocation6 + $0x28] sm:$0xff] }
  0x18   :  { %304 = vmatpush.msra.mxu2 %v297_v20  ;;  %v286_v32 = vld [vmem:[#allocation3 + $0x18] sm:$0xff]  ;;  %v328_v48 = vld [vmem:[#allocation6 + $0x20] sm:$0xff]  ;;  %v326_v57 = vld [vmem:[#allocation6 + $0x10] sm:$0xff] }
  0x19   :  { %v339_v36 = vld [vmem:[#allocation6 + $0x78] sm:$0xff]  ;;  %v325_v58 = vld [vmem:[#allocation6 + $0x8] sm:$0xff]  ;;  %v324_v59 = vld [vmem:[#allocation6] sm:$0xff] }
  0x1a   :  { %305 = vmatpush.msra.mxu2 %v296_v21  ;;  %344 = vmatpush.msra.mxu3 %v339_v36  ;;  %v335_v40 = vld [vmem:[#allocation6 + $0x58] sm:$0xff] }
  0x1b   :  { %v331_v44 = vld [vmem:[#allocation6 + $0x38] sm:$0xff] }
  0x1c   :  { %306 = vmatpush.msra.mxu2 %v295_v22  ;;  %345 = vmatpush.msra.mxu3 %v338_v37  ;;  %v327_v50 = vld [vmem:[#allocation6 + $0x18] sm:$0xff] }
  0x1d   :  { %v402_v52 = vld [vmem:[%s617_s8] ss:$0 sm:$0xff] }
  0x1e   :  { %307 = vmatpush.msra.mxu2 %v294_v23  ;;  %346 = vmatpush.msra.mxu3 %v337_v38  ;;  %v403_v60 = vld [vmem:[%s619_s10] ss:$0 sm:$0xff] }
  0x1f   :  { %v404_v0 = vld [vmem:[%s621_s12] ss:$0 sm:$0xff] }
  0x20   :  { %308 = vmatpush.msra.mxu2 %v293_v24  ;;  %347 = vmatpush.msra.mxu3 %v336_v39 }
  0x22   :  { %309 = vmatpush.msra.mxu2 %v292_v25  ;;  %348 = vmatpush.msra.mxu3 %v335_v40 }
  0x24   :  { %310 = vmatpush.msra.mxu2 %v291_v26  ;;  %349 = vmatpush.msra.mxu3 %v334_v41 }
  0x26   :  { %311 = vmatpush.msra.mxu2 %v290_v27  ;;  %350 = vmatpush.msra.mxu3 %v333_v42 }
  0x28   :  { %312 = vmatpush.msra.mxu2 %v289_v28  ;;  %351 = vmatpush.msra.mxu3 %v332_v43 }
  0x2a   :  { %313 = vmatpush.msra.mxu2 %v288_v29  ;;  %352 = vmatpush.msra.mxu3 %v331_v44 }
  0x2c   :  { %314 = vmatpush.msra.mxu2 %v287_v30  ;;  %353 = vmatpush.msra.mxu3 %v330_v46 }
  0x2e   :  { %315 = vmatpush.msra.mxu2 %v286_v32  ;;  %354 = vmatpush.msra.mxu3 %v329_v47 }
  0x30   :  { %316 = vmatpush.msra.mxu2 %v285_v33  ;;  %355 = vmatpush.msra.mxu3 %v328_v48 }
  0x32   :  { %317 = vmatpush.msra.mxu2 %v284_v34  ;;  %356 = vmatpush.msra.mxu3 %v327_v50 }
  0x34   :  { %318 = vmatpush.msra.mxu2 %v283_v35  ;;  %357 = vmatpush.msra.mxu3 %v326_v57 }
  0x36   :  { %358 = vmatpush.msra.mxu3 %v325_v58 }
  0x38   :  { %359 = vmatpush.msra.mxu3 %v324_v59 }
  0x8f   :  { %v117_v11 = vpop.f32.mrf.mxu0 }
  0x90   :  { %v120_v14 = vadd.f32 %v117_v11, %v93_v10 }
  0x92   :  { %122 = vst.msk [vmem:[#allocation2] sm:$0xff] %vm81_vm0, %v120_v14 }
  0x99   :  { %v194_v15 = vld [vmem:[#allocation2] sm:$0xff] }
  0x9a   :  { %389 = vmatmul.msk.f32.vlgmr.msrb.gmra.mxu0 %vm81_vm0, %v194_v15 }
  0xb6   :  { %v148_v17 = vpop.trf.xlu0 }
  0xb7   :  { %387 = vmatmul.msk.f32.vlgmr.msra.gmra.mxu1 %vm164_vm6, %v148_v17 }
  0xb8   :  { %392 = vmatpush.msk.msra.mxu1 %vm199_vm5, %v249_v16 }
  0xbf   :  { %391 = vmatmul.msk.f32.vlgmr.msrb.gmra.mxu1 %vm81_vm0, %v192_v18 }
 0x117   :  { %v220_v49 = vpop.f32.mrf.mxu0 }
 0x134   :  { %v189_v31 = vpop.f32.mrf.mxu1 }
 0x135   :  { %393 = vmatmul.msk.f32.vlgmr.msra.gmra.mxu1 %vm81_vm0, %v189_v31 }
 0x13c   :  { %v246_v45 = vpop.f32.mrf.mxu1 }
 0x13d   :  { %v247_v51 = vadd.f32 %v246_v45, %v220_v49 }
 0x1b2   :  { %v273_v53 = vpop.f32.mrf.mxu1 }
 0x1b3   :  { %v276_v54 = vadd.f32 %v273_v53, %v247_v51 }
 0x1b5   :  { %v281_v55 = vadd.f32 %v402_v52, %v276_v54 }
 0x1b7   :  { %v282_v56 = vmax.f32 %v281_v55, 0.0 }
 0x1b9   :  { %319 = vmatmul.f32.vlgmr.msra.gmra.mxu2 %v282_v56 }
 0x23c   :  { %v320_v61 = vpop.f32.mrf.mxu2 }
 0x23d   :  { %v321_v62 = vadd.f32 %v403_v60, %v320_v61 }
 0x23f   :  { %v323_v63 = vmax.f32 %v321_v62, 0.0 }
 0x241   :  { %360 = vmatmul.f32.vlgmr.msra.gmra.mxu3 %v323_v63 }
 0x2c4   :  { %v361_v1 = vpop.f32.mrf.mxu3 }
 0x2c5   :  { %v362_v2 = vadd.f32 %v404_v0, %v361_v1 }
 0x2c7   :  { %364 = vst [vmem:[#allocation8] sm:$0xff] %v362_v2 }
 0x2c8   :  { %375 = dma.vmem_to_hbm [thread:$0]  %s371_s17, 128, %s373_s9, [#allocation5]  }
 0x2c9   :  { %481 = dma.done.wait [#allocation5], 128  }
 0x2ca   :  { %482 = vsyncadd [#allocation5], 4294967168 }
 0x2cb   :  { %380 = vsyncpa [#allocation4], 1 }
 0x2cc   :  { %381 = vsyncpa [#allocation7], 1 }
 0x2cd   :  { %382 = vsyncpa [#allocation5], 1 }

</bundles_post_ra>
